<compile_context>
chip_gen: v7x
topology: tpu7x:2x2x1
jax: 0.10.0
libtpu: 0.0.40
codegen_flags: <defaults>
</compile_context>

<pallas_src>
import math
import functools

import jax
import jax.numpy as jnp
from jax import lax
from jax.experimental import pallas as pl
from jax.experimental.pallas import tpu as pltpu


def calculate_conv1d_padding(stride, kernel_size, d_in, d_out, dilation=1):
    padding = math.ceil(
        (stride * (d_out - 1) - d_in + dilation * (kernel_size - 1) + 1) / 2
    )
    assert padding >= 0
    return padding


def _vmem_limit_bytes():
    """<= 48 MiB, and <= 5/8 of physical VMEM (v7x only has 64 MiB)."""
    try:
        phys = pltpu.get_tpu_info().vmem_capacity_bytes
    except Exception:
        phys = 64 * 1024 * 1024
    return int(min(48 * 1024 * 1024, (phys * 5) // 8))


def _pick_batch_tile(B, C, L, itemsize):
    """Largest divisor of B that keeps the x block <= ~2 MiB while leaving at
    least 2 grid steps (so both v7x TensorCores get work on the parallel axis)."""
    tb = 1
    for cand in range(2, min(B, 8) + 1):
        if B % cand != 0:
            continue
        if cand * C * L * itemsize > (2 << 20):
            continue
        if B // cand < 2:
            continue
        tb = cand
    return tb


def _resblock_kernel(x_ref, w1_ref, c1_ref, w2_ref, c2_ref, o_ref, *,
                     TB, L, C, Ch, K, pad, mode):
    """One grid step = TB batch elements.  x_ref: (TB, C, L) producer dtype.
    Weights are BN-folded bf16; biases f32."""
    # Hoisted (not CSE'd by JAX if placed inside the loops).
    lane = lax.broadcasted_iota(jnp.int32, (Ch, L), 1) if mode == "roll" else None

    for t in range(TB):                                   # static unroll, TB small
        x = x_ref[t]                                      # (C, L) producer dtype
        x_bf = x.astype(jnp.bfloat16)                     # in-kernel cast (VMEM only)

        # ---- conv1 (1x1) + folded BN1 + ReLU; hidden goes bf16 immediately ----
        h = jnp.dot(w1_ref[...], x_bf, preferred_element_type=jnp.float32)  # (Ch, L)
        h_bf = jnp.maximum(h + c1_ref[...], 0.0).astype(jnp.bfloat16)

        # ---- conv2 (kernel K) + folded BN2 ----
        if mode == "roll":
            # K accumulated MXU dots on lane-rolled bf16 hidden tiles.
            # rolled[ch, l] = h[ch, l + k - pad]; wrapped edge lanes masked to 0.
            y = None
            for k in range(K):
                shift = pad - k
                hk = h_bf if shift == 0 else jnp.roll(h_bf, shift, axis=1)
                lo, hi = max(shift, 0), L + min(shift, 0)
                if lo > 0 or hi < L:
                    hk = jnp.where((lane >= lo) & (lane < hi), hk, 0
                                   ).astype(jnp.bfloat16)
                part = jnp.dot(w2_ref[k], hk, preferred_element_type=jnp.float32)
                y = part if y is None else y + part
        else:
            # im2col: one (C, K*Ch) x (K*Ch, L) matmul; slab built entirely in bf16.
            if pad > 0:
                zp = jnp.zeros((Ch, pad), jnp.bfloat16)
                hp = jnp.concatenate([zp, h_bf, zp], axis=1)      # (Ch, L + 2*pad)
            else:
                hp = h_bf
            slab = jnp.concatenate([hp[:, k:k + L] for k in range(K)], axis=0)
            y = jnp.dot(w2_ref[...], slab, preferred_element_type=jnp.float32)

        y = jnp.maximum(y + c2_ref[...], 0.0)             # bias + ReLU (f32)

        # ---- residual add in f32, cast only on the final store ----
        o_ref[t] = (x.astype(jnp.float32) + y).astype(o_ref.dtype)


def resblock_1d_pallas(x_ncl, params, *, kernel_size=3, stride=1, dilation=1,
                       eps=1e-5, conv2_mode="auto", out_dtype=None,
                       batch_tile=None):
    """x_ncl: (B, C, L) in NCL layout (PyTorch Conv1d layout). Returns (B, C, L)."""
    assert stride == 1 and dilation == 1, "default ResBlock_1d config"
    B, C, L = x_ncl.shape
    Ch = C // 2
    K = kernel_size
    pad = calculate_conv1d_padding(stride, K, L, L, dilation)
    # Symmetric padding must reproduce the input length (odd K, stride 1).
    assert (L + 2 * pad - dilation * (K - 1) - 1) // stride + 1 == L

    if out_dtype is None:
        out_dtype = x_ncl.dtype
    if conv2_mode == "auto":
        # v6e/v7x MXUs are 256 deep: per-tap dots only fill them at Ch >= 256;
        # below that the single K*Ch-deep im2col contraction fills better.
        conv2_mode = "roll" if Ch >= 256 else "im2col"

    # Fold BatchNorm (eval) + conv bias:  BN(conv_w(x)+b) = conv_{w*s}(x) + c,
    #   s = gamma / sqrt(var + eps),  c = (b - mean) * s + beta.
    s1 = params["bn1_gamma"] / jnp.sqrt(params["bn1_var"] + eps)
    c1 = (params["conv1_b"] - params["bn1_mean"]) * s1 + params["bn1_beta"]
    s2 = params["bn2_gamma"] / jnp.sqrt(params["bn2_var"] + eps)
    c2 = (params["conv2_b"] - params["bn2_mean"]) * s2 + params["bn2_beta"]

    # conv1 weight (Ch, C, 1) -> (Ch, C), BN scale folded, bf16 for the MXU.
    w1f = (params["conv1_w"][:, :, 0] * s1[:, None]).astype(jnp.bfloat16)
    if conv2_mode == "roll":
        # (C, Ch, K) -> (K, C, Ch), per-tap weights, BN scale folded.
        w2f = (jnp.transpose(params["conv2_w"], (2, 0, 1))
               * s2[None, :, None]).astype(jnp.bfloat16)
        w2_block, w2_imap = (K, C, Ch), (lambda b: (0, 0, 0))
    else:
        # (C, Ch, K) -> im2col slab (C, K*Ch): column index = k*Ch + ch.
        w2f = (jnp.transpose(params["conv2_w"], (0, 2, 1)).reshape(C, K * Ch)
               * s2[:, None]).astype(jnp.bfloat16)
        w2_block, w2_imap = (C, K * Ch), (lambda b: (0, 0))

    TB = batch_tile if batch_tile is not None else _pick_batch_tile(
        B, C, L, x_ncl.dtype.itemsize)
    assert B % TB == 0

    kern = functools.partial(_resblock_kernel, TB=TB, L=L, C=C, Ch=Ch, K=K,
                             pad=pad, mode=conv2_mode)

    flops = 2 * B * L * (C * Ch + K * Ch * C)
    bytes_accessed = (B * C * L * (x_ncl.dtype.itemsize
                                   + jnp.dtype(out_dtype).itemsize)
                      + w1f.size * 2 + w2f.size * 2 + (Ch + C) * 4)
    cost = pl.CostEstimate(flops=int(flops), transcendentals=0,
                           bytes_accessed=int(bytes_accessed))

    def call(single_buffer_weights):
        # Constant index_maps never re-fetch; single-buffering them saves VMEM
        # (~3 MiB at C=1024/K=3 for w2f) -- matters under v7x's 64 MiB budget.
        wk = (dict(pipeline_mode=pl.Buffered(1))
              if single_buffer_weights else {})
        in_specs = [
            pl.BlockSpec((TB, C, L), lambda b: (b, 0, 0)),        # x (producer dtype)
            pl.BlockSpec((Ch, C), lambda b: (0, 0), **wk),        # w1f  (bf16, resident)
            pl.BlockSpec((Ch, 1), lambda b: (0, 0), **wk),        # c1   (f32,  resident)
            pl.BlockSpec(w2_block, w2_imap, **wk),                # w2f  (bf16, resident)
            pl.BlockSpec((C, 1), lambda b: (0, 0), **wk),         # c2   (f32,  resident)
        ]
        out = pl.pallas_call(
            kern,
            out_shape=jax.ShapeDtypeStruct((B, C, L), out_dtype),
            grid_spec=pltpu.PrefetchScalarGridSpec(
                num_scalar_prefetch=0,
                grid=(B // TB,),
                in_specs=in_specs,
                out_specs=pl.BlockSpec((TB, C, L), lambda b: (b, 0, 0)),
            ),
            compiler_params=pltpu.CompilerParams(
                dimension_semantics=("parallel",),
                vmem_limit_bytes=_vmem_limit_bytes(),
            ),
            cost_estimate=cost,
        )(x_ncl, w1f, c1.reshape(Ch, 1), w2f, c2.reshape(C, 1))
        return jax.block_until_ready(out)

    try:
        return call(True)
    except Exception:
        # Fallback for jax versions without Buffered(1) single-buffering support.
        return call(False)


def resblock_1d_reference(x, params, *, kernel_size=3, stride=1, dilation=1,
                          eps=1e-5):
    """Pure-JAX f32 reference of the eval-mode PyTorch module (NCL layout)."""
    B, C, L = x.shape
    K = kernel_size
    pad = calculate_conv1d_padding(stride, K, L, L, dilation)

    def bn(z, g, b, m, v):
        return (z - m[None, :, None]) / jnp.sqrt(v + eps)[None, :, None] \
               * g[None, :, None] + b[None, :, None]

    w1 = params["conv1_w"][:, :, 0]                                  # (Ch, C)
    h = jnp.einsum("oc,bcl->bol", w1, x) + params["conv1_b"][None, :, None]
    h = jnp.maximum(bn(h, params["bn1_gamma"], params["bn1_beta"],
                       params["bn1_mean"], params["bn1_var"]), 0.0)
    hp = jnp.pad(h, ((0, 0), (0, 0), (pad, pad)))
    y = sum(jnp.einsum("oc,bcl->bol", params["conv2_w"][:, :, k],
                       hp[:, :, k:k + L]) for k in range(K))
    y = y + params["conv2_b"][None, :, None]
    y = jnp.maximum(bn(y, params["bn2_gamma"], params["bn2_beta"],
                       params["bn2_mean"], params["bn2_var"]), 0.0)
    return x + y


def init_params(key, C, K):
    Ch = C // 2
    ks = jax.random.split(key, 10)
    return {
        "conv1_w": 0.1 * jax.random.normal(ks[0], (Ch, C, 1), jnp.float32),
        "conv1_b": 0.1 * jax.random.normal(ks[1], (Ch,), jnp.float32),
        "bn1_gamma": 1.0 + 0.05 * jax.random.normal(ks[2], (Ch,), jnp.float32),
        "bn1_beta": 0.05 * jax.random.normal(ks[3], (Ch,), jnp.float32),
        "bn1_mean": 0.05 * jax.random.normal(ks[4], (Ch,), jnp.float32),
        "bn1_var": jnp.abs(1.0 + 0.05 * jax.random.normal(ks[5], (Ch,), jnp.float32)),
        "conv2_w": 0.1 * jax.random.normal(ks[6], (C, Ch, K), jnp.float32),
        "conv2_b": 0.1 * jax.random.normal(ks[7], (C,), jnp.float32),
        "bn2_gamma": 1.0 + 0.05 * jax.random.normal(ks[8], (C,), jnp.float32),
        "bn2_beta": 0.05 * jax.random.normal(ks[9], (C,), jnp.float32),
        "bn2_mean": jnp.zeros((C,), jnp.float32),
        "bn2_var": jnp.ones((C,), jnp.float32),
    }


if __name__ == "__main__":
    key = jax.random.PRNGKey(0)

    # Config 1: module-like tiny shapes (in_channel=4, in_dim=16) -> im2col path,
    # f32 output, TB=1 (keeps 2 grid steps for two v7x TensorCores).
    B, C, L, K = 2, 4, 16, 3
    kx, kp, key = jax.random.split(key, 3)
    x = jax.random.normal(kx, (B, C, L), jnp.float32)
    params = init_params(kp, C, K)
    out = resblock_1d_pallas(x, params, kernel_size=K, stride=1, dilation=1)
    out = jax.block_until_ready(out)
    assert out.shape == (B, C, L)
    ref = resblock_1d_reference(x, params, kernel_size=K, stride=1, dilation=1)
    err1 = float(jnp.max(jnp.abs(out.astype(jnp.float32) - ref)))
    assert err1 < 5e-2, f"config1 max abs err too large: {err1}"

    # Config 2: exercises the rolled K-dot conv2 path, batch tiling (TB=2) and
    # the bf16 output store (residual add still f32 in-kernel).
    B2, C2, L2 = 4, 8, 128
    kx2, kp2, key = jax.random.split(key, 3)
    x2 = jax.random.normal(kx2, (B2, C2, L2), jnp.float32)
    params2 = init_params(kp2, C2, K)
    out2 = resblock_1d_pallas(x2, params2, kernel_size=K, stride=1, dilation=1,
                              conv2_mode="roll", out_dtype=jnp.bfloat16)
    out2 = jax.block_until_ready(out2)
    assert out2.shape == (B2, C2, L2)
    ref2 = resblock_1d_reference(x2, params2, kernel_size=K, stride=1, dilation=1)
    err2 = float(jnp.max(jnp.abs(out2.astype(jnp.float32) - ref2)))
    assert err2 < 1e-1, f"config2 max abs err too large: {err2}"   # bf16 output store

    print("KERNEL_OK")
</pallas_src>

<mosaic_0001>
module attributes {stable_mosaic.version = 11 : i64} {
  func.func @_resblock_kernel(%arg0: i32, %arg1: memref<1x4x16xf32, #tpu.memory_space<vmem>>, %arg2: memref<2x4xbf16, #tpu.memory_space<vmem>>, %arg3: memref<2x1xf32, #tpu.memory_space<vmem>>, %arg4: memref<4x6xbf16, #tpu.memory_space<vmem>>, %arg5: memref<4x1xf32, #tpu.memory_space<vmem>>, %arg6: memref<1x4x16xf32, #tpu.memory_space<vmem>>) attributes {dimension_semantics = [#tpu.dimension_semantics<parallel>], iteration_bounds = array<i64: 2>, scalar_prefetch = 0 : i64, scratch_operands = 0 : i64, tpu.core_type = #tpu.core_type<tc>, window_params = [{transform_indices = @transform_0, window_bounds = array<i64: 1, 4, 16>}, {pipeline_mode = #tpu.pipeline_mode<synchronous>, transform_indices = @transform_1, window_bounds = array<i64: 2, 4>}, {pipeline_mode = #tpu.pipeline_mode<synchronous>, transform_indices = @transform_2, window_bounds = array<i64: 2, 1>}, {pipeline_mode = #tpu.pipeline_mode<synchronous>, transform_indices = @transform_3, window_bounds = array<i64: 4, 6>}, {pipeline_mode = #tpu.pipeline_mode<synchronous>, transform_indices = @transform_4, window_bounds = array<i64: 4, 1>}, {transform_indices = @transform_5, window_bounds = array<i64: 1, 4, 16>}]} {
    %c0 = arith.constant 0 : index
    %c0_0 = arith.constant 0 : index
    %c0_1 = arith.constant 0 : index
    %0 = vector.load %arg1[%c0, %c0_0, %c0_1] : memref<1x4x16xf32, #tpu.memory_space<vmem>>, vector<1x4x16xf32>
    %1 = vector.shape_cast %0 : vector<1x4x16xf32> to vector<4x16xf32>
    %2 = arith.truncf %1 : vector<4x16xf32> to vector<4x16xbf16>
    %c0_2 = arith.constant 0 : index
    %c0_3 = arith.constant 0 : index
    %3 = vector.load %arg2[%c0_2, %c0_3] : memref<2x4xbf16, #tpu.memory_space<vmem>>, vector<2x4xbf16>
    %cst = arith.constant dense<0.000000e+00> : vector<2x16xf32>
    %4 = tpu.matmul %3, %2, %cst {dimension_numbers = #tpu.dot_dimension_numbers<[1], [0], [0], [1], [0, 0, 1, 1], [], []>} : vector<2x4xbf16>, vector<4x16xbf16>, vector<2x16xf32> -> vector<2x16xf32>
    %c0_4 = arith.constant 0 : index
    %c0_5 = arith.constant 0 : index
    %5 = vector.load %arg3[%c0_4, %c0_5] : memref<2x1xf32, #tpu.memory_space<vmem>>, vector<2x1xf32>
    %6 = vector.broadcast %5 : vector<2x1xf32> to vector<2x16xf32>
    %7 = arith.addf %4, %6 : vector<2x16xf32>
    %cst_6 = arith.constant 0.000000e+00 : f32
    %8 = vector.broadcast %cst_6 : f32 to vector<2x16xf32>
    %9 = arith.maximumf %7, %8 : vector<2x16xf32>
    %10 = arith.truncf %9 : vector<2x16xf32> to vector<2x16xbf16>
    %cst_7 = arith.constant 0.000000e+00 : bf16
    %11 = vector.broadcast %cst_7 : bf16 to vector<2x1xbf16>
    %12 = tpu.concatenate %11, %10, %11 in 1 : vector<2x1xbf16>, vector<2x16xbf16>, vector<2x1xbf16> -> vector<2x18xbf16>
    %13 = vector.extract_strided_slice %12 {offsets = [0, 0], sizes = [2, 16], strides = [1, 1]} : vector<2x18xbf16> to vector<2x16xbf16>
    %14 = vector.extract_strided_slice %12 {offsets = [0, 1], sizes = [2, 16], strides = [1, 1]} : vector<2x18xbf16> to vector<2x16xbf16>
    %15 = vector.extract_strided_slice %12 {offsets = [0, 2], sizes = [2, 16], strides = [1, 1]} : vector<2x18xbf16> to vector<2x16xbf16>
    %16 = tpu.concatenate %13, %14, %15 in 0 : vector<2x16xbf16>, vector<2x16xbf16>, vector<2x16xbf16> -> vector<6x16xbf16>
    %c0_8 = arith.constant 0 : index
    %c0_9 = arith.constant 0 : index
    %17 = vector.load %arg4[%c0_8, %c0_9] : memref<4x6xbf16, #tpu.memory_space<vmem>>, vector<4x6xbf16>
    %cst_10 = arith.constant dense<0.000000e+00> : vector<4x16xf32>
    %18 = tpu.matmul %17, %16, %cst_10 {dimension_numbers = #tpu.dot_dimension_numbers<[1], [0], [0], [1], [0, 0, 1, 1], [], []>} : vector<4x6xbf16>, vector<6x16xbf16>, vector<4x16xf32> -> vector<4x16xf32>
    %c0_11 = arith.constant 0 : index
    %c0_12 = arith.constant 0 : index
    %19 = vector.load %arg5[%c0_11, %c0_12] : memref<4x1xf32, #tpu.memory_space<vmem>>, vector<4x1xf32>
    %20 = vector.broadcast %19 : vector<4x1xf32> to vector<4x16xf32>
    %21 = arith.addf %18, %20 : vector<4x16xf32>
    %cst_13 = arith.constant 0.000000e+00 : f32
    %22 = vector.broadcast %cst_13 : f32 to vector<4x16xf32>
    %23 = arith.maximumf %21, %22 : vector<4x16xf32>
    %24 = arith.addf %1, %23 : vector<4x16xf32>
    %c0_14 = arith.constant 0 : index
    %c0_15 = arith.constant 0 : index
    %c0_16 = arith.constant 0 : index
    %25 = vector.load %arg6[%c0_14, %c0_15, %c0_16] : memref<1x4x16xf32, #tpu.memory_space<vmem>>, vector<1x4x16xf32>
    %26 = vector.shape_cast %25 : vector<1x4x16xf32> to vector<4x16xf32>
    %27 = vector.shape_cast %24 : vector<4x16xf32> to vector<1x4x16xf32>
    tpu.vector_store %arg6[%c0_14, %c0_15, %c0_16], %27 {strides = array<i32>} : memref<1x4x16xf32, #tpu.memory_space<vmem>>, vector<1x4x16xf32>,
    return
  }
  func.func @transform_0(%arg0: i32) -> (i32, i32, i32) {
    %c0_i32 = arith.constant 0 : i32
    %c0_i32_0 = arith.constant 0 : i32
    %c0_i32_1 = arith.constant 0 : i32
    return %arg0, %c0_i32, %c0_i32_0 : i32, i32, i32
  }
  func.func @transform_1(%arg0: i32) -> (i32, i32) {
    %c0_i32 = arith.constant 0 : i32
    %c0_i32_0 = arith.constant 0 : i32
    %c0_i32_1 = arith.constant 0 : i32
    return %c0_i32, %c0_i32_0 : i32, i32
  }
  func.func @transform_2(%arg0: i32) -> (i32, i32) {
    %c0_i32 = arith.constant 0 : i32
    %c0_i32_0 = arith.constant 0 : i32
    %c0_i32_1 = arith.constant 0 : i32
    return %c0_i32, %c0_i32_0 : i32, i32
  }
  func.func @transform_3(%arg0: i32) -> (i32, i32) {
    %c0_i32 = arith.constant 0 : i32
    %c0_i32_0 = arith.constant 0 : i32
    %c0_i32_1 = arith.constant 0 : i32
    return %c0_i32, %c0_i32_0 : i32, i32
  }
  func.func @transform_4(%arg0: i32) -> (i32, i32) {
    %c0_i32 = arith.constant 0 : i32
    %c0_i32_0 = arith.constant 0 : i32
    %c0_i32_1 = arith.constant 0 : i32
    return %c0_i32, %c0_i32_0 : i32, i32
  }
  func.func @transform_5(%arg0: i32) -> (i32, i32, i32) {
    %c0_i32 = arith.constant 0 : i32
    %c0_i32_0 = arith.constant 0 : i32
    %c0_i32_1 = arith.constant 0 : i32
    return %arg0, %c0_i32, %c0_i32_0 : i32, i32, i32
  }
}

module attributes {stable_mosaic.version = 11 : i64} {
  func.func @_resblock_kernel(%arg0: i32, %arg1: memref<1x4x16xf32, #tpu.memory_space<vmem>>, %arg2: memref<2x4xbf16, #tpu.memory_space<vmem>>, %arg3: memref<2x1xf32, #tpu.memory_space<vmem>>, %arg4: memref<4x6xbf16, #tpu.memory_space<vmem>>, %arg5: memref<4x1xf32, #tpu.memory_space<vmem>>, %arg6: memref<1x4x16xf32, #tpu.memory_space<vmem>>) attributes {dimension_semantics = [#tpu.dimension_semantics<parallel>], iteration_bounds = array<i64: 2>, scalar_prefetch = 0 : i64, scratch_operands = 0 : i64, tpu.core_type = #tpu.core_type<tc>, window_params = [{transform_indices = @transform_0, window_bounds = array<i64: 1, 4, 16>}, {pipeline_mode = #tpu.pipeline_mode<synchronous>, transform_indices = @transform_1, window_bounds = array<i64: 2, 4>}, {pipeline_mode = #tpu.pipeline_mode<synchronous>, transform_indices = @transform_2, window_bounds = array<i64: 2, 1>}, {pipeline_mode = #tpu.pipeline_mode<synchronous>, transform_indices = @transform_3, window_bounds = array<i64: 4, 6>}, {pipeline_mode = #tpu.pipeline_mode<synchronous>, transform_indices = @transform_4, window_bounds = array<i64: 4, 1>}, {transform_indices = @transform_5, window_bounds = array<i64: 1, 4, 16>}]} {
    %c0 = arith.constant 0 : index
    %c0_0 = arith.constant 0 : index
    %c0_1 = arith.constant 0 : index
    %0 = vector.load %arg1[%c0, %c0_0, %c0_1] : memref<1x4x16xf32, #tpu.memory_space<vmem>>, vector<1x4x16xf32>
    %1 = vector.shape_cast %0 : vector<1x4x16xf32> to vector<4x16xf32>
    %2 = arith.truncf %1 : vector<4x16xf32> to vector<4x16xbf16>
    %c0_2 = arith.constant 0 : index
    %c0_3 = arith.constant 0 : index
    %3 = vector.load %arg2[%c0_2, %c0_3] : memref<2x4xbf16, #tpu.memory_space<vmem>>, vector<2x4xbf16>
    %cst = arith.constant dense<0.000000e+00> : vector<2x16xf32>
    %4 = tpu.matmul %3, %2, %cst {dimension_numbers = #tpu.dot_dimension_numbers<[1], [0], [0], [1], [0, 0, 1, 1], [], []>} : vector<2x4xbf16>, vector<4x16xbf16>, vector<2x16xf32> -> vector<2x16xf32>
    %c0_4 = arith.constant 0 : index
    %c0_5 = arith.constant 0 : index
    %5 = vector.load %arg3[%c0_4, %c0_5] : memref<2x1xf32, #tpu.memory_space<vmem>>, vector<2x1xf32>
    %6 = vector.broadcast %5 : vector<2x1xf32> to vector<2x16xf32>
    %7 = arith.addf %4, %6 : vector<2x16xf32>
    %cst_6 = arith.constant 0.000000e+00 : f32
    %8 = vector.broadcast %cst_6 : f32 to vector<2x16xf32>
    %9 = arith.maximumf %7, %8 : vector<2x16xf32>
    %10 = arith.truncf %9 : vector<2x16xf32> to vector<2x16xbf16>
    %cst_7 = arith.constant 0.000000e+00 : bf16
    %11 = vector.broadcast %cst_7 : bf16 to vector<2x1xbf16>
    %12 = tpu.concatenate %11, %10, %11 in 1 : vector<2x1xbf16>, vector<2x16xbf16>, vector<2x1xbf16> -> vector<2x18xbf16>
    %13 = vector.extract_strided_slice %12 {offsets = [0, 0], sizes = [2, 16], strides = [1, 1]} : vector<2x18xbf16> to vector<2x16xbf16>
    %14 = vector.extract_strided_slice %12 {offsets = [0, 1], sizes = [2, 16], strides = [1, 1]} : vector<2x18xbf16> to vector<2x16xbf16>
    %15 = vector.extract_strided_slice %12 {offsets = [0, 2], sizes = [2, 16], strides = [1, 1]} : vector<2x18xbf16> to vector<2x16xbf16>
    %16 = tpu.concatenate %13, %14, %15 in 0 : vector<2x16xbf16>, vector<2x16xbf16>, vector<2x16xbf16> -> vector<6x16xbf16>
    %c0_8 = arith.constant 0 : index
    %c0_9 = arith.constant 0 : index
    %17 = vector.load %arg4[%c0_8, %c0_9] : memref<4x6xbf16, #tpu.memory_space<vmem>>, vector<4x6xbf16>
    %cst_10 = arith.constant dense<0.000000e+00> : vector<4x16xf32>
    %18 = tpu.matmul %17, %16, %cst_10 {dimension_numbers = #tpu.dot_dimension_numbers<[1], [0], [0], [1], [0, 0, 1, 1], [], []>} : vector<4x6xbf16>, vector<6x16xbf16>, vector<4x16xf32> -> vector<4x16xf32>
    %c0_11 = arith.constant 0 : index
    %c0_12 = arith.constant 0 : index
    %19 = vector.load %arg5[%c0_11, %c0_12] : memref<4x1xf32, #tpu.memory_space<vmem>>, vector<4x1xf32>
    %20 = vector.broadcast %19 : vector<4x1xf32> to vector<4x16xf32>
    %21 = arith.addf %18, %20 : vector<4x16xf32>
    %cst_13 = arith.constant 0.000000e+00 : f32
    %22 = vector.broadcast %cst_13 : f32 to vector<4x16xf32>
    %23 = arith.maximumf %21, %22 : vector<4x16xf32>
    %24 = arith.addf %1, %23 : vector<4x16xf32>
    %c0_14 = arith.constant 0 : index
    %c0_15 = arith.constant 0 : index
    %c0_16 = arith.constant 0 : index
    %25 = vector.load %arg6[%c0_14, %c0_15, %c0_16] : memref<1x4x16xf32, #tpu.memory_space<vmem>>, vector<1x4x16xf32>
    %26 = vector.shape_cast %25 : vector<1x4x16xf32> to vector<4x16xf32>
    %27 = vector.shape_cast %24 : vector<4x16xf32> to vector<1x4x16xf32>
    tpu.vector_store %arg6[%c0_14, %c0_15, %c0_16], %27 {strides = array<i32>} : memref<1x4x16xf32, #tpu.memory_space<vmem>>, vector<1x4x16xf32>,
    return
  }
  func.func @transform_0(%arg0: i32) -> (i32, i32, i32) {
    %c0_i32 = arith.constant 0 : i32
    %c0_i32_0 = arith.constant 0 : i32
    %c0_i32_1 = arith.constant 0 : i32
    return %arg0, %c0_i32, %c0_i32_0 : i32, i32, i32
  }
  func.func @transform_1(%arg0: i32) -> (i32, i32) {
    %c0_i32 = arith.constant 0 : i32
    %c0_i32_0 = arith.constant 0 : i32
    %c0_i32_1 = arith.constant 0 : i32
    return %c0_i32, %c0_i32_0 : i32, i32
  }
  func.func @transform_2(%arg0: i32) -> (i32, i32) {
    %c0_i32 = arith.constant 0 : i32
    %c0_i32_0 = arith.constant 0 : i32
    %c0_i32_1 = arith.constant 0 : i32
    return %c0_i32, %c0_i32_0 : i32, i32
  }
  func.func @transform_3(%arg0: i32) -> (i32, i32) {
    %c0_i32 = arith.constant 0 : i32
    %c0_i32_0 = arith.constant 0 : i32
    %c0_i32_1 = arith.constant 0 : i32
    return %c0_i32, %c0_i32_0 : i32, i32
  }
  func.func @transform_4(%arg0: i32) -> (i32, i32) {
    %c0_i32 = arith.constant 0 : i32
    %c0_i32_0 = arith.constant 0 : i32
    %c0_i32_1 = arith.constant 0 : i32
    return %c0_i32, %c0_i32_0 : i32, i32
  }
  func.func @transform_5(%arg0: i32) -> (i32, i32, i32) {
    %c0_i32 = arith.constant 0 : i32
    %c0_i32_0 = arith.constant 0 : i32
    %c0_i32_1 = arith.constant 0 : i32
    return %arg0, %c0_i32, %c0_i32_0 : i32, i32, i32
  }
}

</mosaic_0001>

<bundles_post_ra>
// kernel: tpu_custom_call.1
= control target key start
LH: loop header
LB: loop body
LE: loop exit
PB: predicated region body
PF: predicated region fallthrough
CT: control target
= control target key end

     0   :  { %10 = vsyncpa [#allocation3], 0  ;;  %s721_s0 = inlined_call_operand.vmem [shape: f32[2,4,16], index: 0, kind: input, shape index: {}]   ;;  %s722_s1 = inlined_call_operand.vmem [shape: bf16[2,4], index: 1, kind: input, shape index: {}]   ;;  %s723_s2 = inlined_call_operand.vmem [shape: f32[2,1], index: 2, kind: input, shape index: {}]   ;;  %s724_s3 = inlined_call_operand.vmem [shape: bf16[4,6], index: 3, kind: input, shape index: {}]   ;;  %s725_s4 = inlined_call_operand.vmem [shape: f32[4,1], index: 4, kind: input, shape index: {}]   ;;  %s726_s5 = inlined_call_operand.hbm [shape: f32[2,4,16], index: 5, kind: output, shape index: {}]  }
   0x1   :  { %12 = vsyncpa [#allocation3 + $0x1], 0  ;;  %s607_s18 = smov 0   ;;  %s609_s19 = smov 0  }
   0x2   :  { %s611_s20 = smov 0   ;;  %s613_s21 = smov 0  }
   0x3 LB: > { %s628_s22 = sadd.s32 4294967295, %s568_s21   ;;  %s432_s23 = sadd.s32 4294967294, %s568_s21   ;;  %s568_s21 = sphi %s613_s21, %s732_s21   ;;  %s564_s20 = sphi %s611_s20, %s731_s20   ;;  %s560_s19 = sphi %s609_s19, %s730_s19   ;;  %s556_s18 = sphi %s607_s18, %s729_s18  }
   0x4   : > { %s632_s24 = sadd.s32 1, %s568_s21   ;;  %s135_s25 = sadd.s32 1, %s564_s20 }
   0x5   : > { %s132_s26 = ssub.s32 %s568_s21, %s632_s24  ;;  %p145_p0 = scmp.ne.s32.totalorder %s564_s20, %s560_s19 }
   0x6   : > { %p133_p1 = scmp.eq.s32.totalorder %s132_s26, 0  ;;  %p146_p2 = scmp.eq.s32.totalorder %s628_s22, 1 }
   0x7   : > { %p151_p3 = scmp.ne.s32.totalorder %s560_s19, %s556_s18  ;;  %p152_p4 = scmp.eq.s32.totalorder %s432_s23, 1 }
   0x8   : > { %s643_s27 = scalar_select %p133_p1, %s564_s20, %s135_s25  }
   0x9   : > { %p645_p5 = por %p146_p2, %p145_p0  ;;  %p649_p6 = por %p152_p4, %p151_p3 }
   0xa   : > { %p435_p7 = scmp.ge.s32.totalorder %s568_s21, 1  ;;  %p189_p8 = scmp.lt.s32.totalorder %s568_s21, 3 }
   0xc   : > { %p190_p9 = pnand %p435_p7, %p189_p8 }
   0xd   : > { %p216_p10 = scmp.lt.s32.totalorder (!%p190_p9), %s628_s22, 1  ;;  %v570_v0 = vmov (!%p190_p9), 0.0   ;;  %vm571_vm0 = vmmov (!%p190_p9), 0   ;;  %v224_v1 = vld [vmem:[%s723_s2] sm:$0x3] (!%p190_p9)  ;;  %v572_v2 = vmov (!%p190_p9), 0  }
   0xe   : > { %193 = sbr.rel (%p190_p9) target bundleno = 725 (0x2d5), region = 40  ;;  %448 = vmatprep.subr.bf16.mxu0 (!%p190_p9), %v570_v0  ;;  %450 = vmatprep.mubr.msk.bf16.mxu0 (!%p190_p9), %vm571_vm0, %v570_v0  ;;  %vm234_vm1 = vcmask (!%p190_p9), 1041408   ;;  %v223_v6 = vld [vmem:[%s722_s1] sm:$0x1] (!%p190_p9)  ;;  %vm230_vm2 = vcmask (!%p190_p9), 31744   ;;  %s573_s14 = smov (!%p190_p9), 1  }
   0xf   : > { %505 = vset.pattern.permute.xlu0 (!%p190_p9), %v572_v2  ;;  %454 = vmatprep.subr.bf16.mxu1 (!%p190_p9), %v570_v0  ;;  %v302_v15 = vld [vmem:[%s725_s4] sm:$0xf] (!%p190_p9)  ;;  %vm283_vm3 = vcmask (!%p190_p9), 7168   ;;  %vm287_vm4 = vcmask (!%p190_p9), 138240   ;;  %s574_s17 = smov (!%p190_p9), 127   ;;  %s575_s23 = smov (!%p190_p9), 126  }
  0x10   : > { %227 = vperm.xlu0 (!%p190_p9), %505, %v224_v1   ;;  %456 = vmatprep.mubr.msk.bf16.mxu1 (!%p190_p9), %vm571_vm0, %v570_v0  ;;  %vm296_vm5 = vcmask (!%p190_p9), 1040384   ;;  %vm312_vm6 = vcmask (!%p190_p9), 1042432   ;;  %v301_v26 = vld [vmem:[%s724_s3] sm:$0x3] (!%p190_p9)  ;;  %vm308_vm7 = vcmask (!%p190_p9), 48128   ;;  %s213_s30 = sand.u32 (!%p190_p9), 1, %s560_s19  }
  0x11   : > { %s436_s6 = sshll.u32 (!%p190_p9), %s213_s30, 2  ;;  %vm357_vm8 = vcmask (!%p190_p9), 125952   ;;  %s360_s13 = scalar_lea.sflag (!%p190_p9), [#allocation3], %s213_s30 }
  0x15   : > { %s217_s7 = scalar_select %p216_p10, %s628_s22, 1 }
  0x17   : > { %s437_s8 = sshll.u32 %s217_s7, 2  ;;  %s441_s7 = sshll.u32 %s628_s22, 6 }
  0x18   : > { %s219_s11 = scalar_lea.vmem %s721_s0, %s437_s8  ;;  %s215_s8 = scalar_lea.vmem [#allocation2], %s436_s6 }
  0x19   : > { %v221_v3 = vld [vmem:[%s219_s11] sm:$0xf]  ;;  %s373_s9 = sshll.u32 %s215_s8, 4  ;;  %s679_s12 = scalar_lea.hbm %s726_s5, %s441_s7  ;;  %s681_s9 = int_to_ptr.vmem [resolvable:$true] %s373_s9 }
  0x1a   : > { %v222_v4 = vpack.c.bf16 %v221_v3, %v221_v3  ;;  %s576_s22 = smov [#allocation2]  }
  0x1b   : > { %s510_s15 = sshll.u32 %s576_s22, 4  ;;  %s511_s15 = int_to_ptr.vmem [resolvable:$false] %s510_s15 }
  0x1c   : > { %v236_v5 = vsel %vm234_vm1, %v222_v4, 0  ;;  %s512_s16 = scalar_lea.vmem %s511_s15, 128  ;;  %p513_p0 = scmp.lt.s32.totalorder %s681_s9, %s511_s15 }
  0x1d   : > { %449 = vmatpush3.bf16.msra.mxu0 %v236_v5 }
  0x20   : > { %451 = vmatmul.mubr.msk.bf16.vlgmr.msra.gmra.mrb[0].mxu0 %vm230_vm2, %v223_v6 }
  0x8f   : > { %v228_v7 = vpop.permute.xlu0 %227 }
  0xf3   : > { %v272_v8 = vpop.f32.mrb[0].mxu0 }
  0xf4   : > { %v273_v9 = vadd.f32 %v272_v8, %v228_v7  ;;  %v452_v10 = vpop.f32.mrb[1].mxu0 }
  0xf5   : > { %v275_v11 = vpop.f32.mrb[2].mxu0 }
  0xf6   : > { %v278_v12 = vmax.f32 %v273_v9, 0.0  ;;  %v453_v13 = vpop.f32.mrb[3].mxu0 }
  0xf8   : > { %v279_v14 = vpack.c.bf16 %v278_v12, %v278_v12 }
  0xfa   : > { %281 = vrot.lane.b32.xlu0 %v279_v14, %s573_s14  ;;  %s506_s14 = scalar_lea.vmem %s681_s9, 64 }
  0xfb   : > { %p507_p11 = scmp.ne.s32.totalorder %s681_s9, %s506_s14  ;;  %p514_p1 = scmp.lt.s32.totalorder %s512_s16, %s506_s14 }
  0xfd   : > { %p508_p12 = pnand %p507_p11, %p645_p5  ;;  %p515_p2 = por %p514_p1, %p513_p0 }
  0xfe   : > { %305 = vperm.xlu0 %505, %v302_v15  }
  0xff   : > { %p509_p13 = pneg %p508_p12 }
 0x101   : > { %p516_p3 = pnand %p515_p2, %p509_p13 }
 0x16c   : > { %v282_v16 = vpop.permute.xlu0 %281 }
 0x16d   : > { %v286_v17 = vsel %vm283_vm3, 0, %v282_v16 }
 0x16e   : > { %v288_v18 = vsel %vm287_vm4, %v286_v17, 0 }
 0x16f   : > { %v290_v19 = vrot.slane %v288_v18, 7  ;;  %v293_v20 = vrot.slane %v288_v18, 6 }
 0x171   : > { %291 = vrot.lane.b32.xlu1 %v290_v19, %s574_s17 }
 0x175   : > { %294 = vrot.lane.b32.xlu1 %v293_v20, %s575_s23 }
 0x17d   : > { %v306_v27 = vpop.permute.xlu0 %305 }
 0x1e3   : > { %v292_v21 = vpop.permute.xlu1 %291 }
 0x1e4   : > { %v298_v22 = vsel %vm296_vm5, %v288_v18, %v292_v21 }
 0x1e7   : > { %v295_v23 = vpop.permute.xlu1 %294 }
 0x1e8   : > { %v300_v24 = vsel %vm234_vm1, %v298_v22, %v295_v23 }
 0x1e9   : > { %v313_v25 = vsel %vm312_vm6, %v300_v24, 0 }
 0x1ea   : > { %455 = vmatpush3.bf16.msra.mxu1 %v313_v25 }
 0x1ed   : > { %457 = vmatmul.mubr.msk.bf16.vlgmr.msra.gmra.mrb[0].mxu1 %vm308_vm7, %v301_v26 }
 0x2c0   : > { %v349_v28 = vpop.f32.mrb[0].mxu1 }
 0x2c1   : > { %v350_v29 = vadd.f32 %v349_v28, %v306_v27  ;;  %v458_v30 = vpop.f32.mrb[1].mxu1 }
 0x2c2   : > { %v352_v31 = vpop.f32.mrb[2].mxu1 }
 0x2c3   : > { %v355_v32 = vmax.f32 %v350_v29, 0.0  ;;  %v459_v33 = vpop.f32.mrb[3].mxu1 }
 0x2c5   : > { %v356_v34 = vadd.f32 %v355_v32, %v221_v3 }
 0x2c7   : > { %358 = vst.msk [vmem:[%s215_s8] sm:$0xf] %vm357_vm8, %v356_v34 }
 0x2c8   : > { %519 = shalt.err (!%p516_p3)
}
 0x2c9   : > { %s520_s17 = scalar_lea.hbm %s679_s12, 64  ;;  %s524_s26 = scalar_lea.hbm %s726_s5, 128 }
 0x2ca   : > { %p521_p4 = scmp.ne.s32.totalorder %s679_s12, %s520_s17  ;;  %p525_p9 = scmp.lt.u32.totalorder %s679_s12, %s726_s5 }
 0x2cb   : > { %p526_p10 = scmp.lt.u32.totalorder %s524_s26, %s520_s17  ;;  %p528_p12 = scmp.lt.u32.totalorder %s520_s17, %s679_s12 }
 0x2cc   : > { %p522_p7 = pnand %p521_p4, %p645_p5 }
 0x2cd   : > { %p527_p11 = por %p526_p10, %p525_p9 }
 0x2ce   : > { %p523_p8 = pneg %p522_p7 }
 0x2cf   : > { %p529_p13 = por %p528_p12, %p527_p11 }
 0x2d1   : > { %p530_p0 = pnand %p529_p13, %p523_p8 }
 0x2d3   : > { %533 = shalt.err (!%p530_p0)
}
 0x2d4   : > { %460 = dma.vmem_to_hbm [thread:$0]  (%p645_p5), %s681_s9, 64, %s679_s12, %s360_s13  }
 0x2d5 PF: > { %p466_p1 = scmp.ge.s32.totalorder %s568_s21, 2  ;;  %s385_s7 = sand.u32 1, %s556_s18  }
 0x2d6   : > { %s386_s8 = scalar_lea.sflag [#allocation3], %s385_s7 }
 0x2d7   : > { %p463_p2 = pnand %p466_p1, %p649_p6 }
 0x2d9   : > { %551 = dma.done.wait (!%p463_p2), %s386_s8, 64  }
 0x2da   : > { %553 = vsyncadd (!%p463_p2), %s386_s8, 4294967232  ;;  %p15_p3 = scmp.ge.s32.totalorder %s632_s24, 4   ;;  %s729_s18 = smov %s560_s19 }
 0x2db   : > { %s730_s19 = smov %s564_s20  ;;  %s731_s20 = smov %s643_s27 }
 0x2dc   : > { %s732_s21 = smov %s632_s24  ;;  %17 = sbr.rel (!%p15_p3) target bundleno = 3 (0x3), region = 75 }
 0x2e3   :  { %391 = vsyncpa [#allocation3], 1 }
 0x2e4   :  { %393 = vsyncpa [#allocation3 + $0x1], 1 }

// kernel: tpu_custom_call.1
= control target key start
LH: loop header
LB: loop body
LE: loop exit
PB: predicated region body
PF: predicated region fallthrough
CT: control target
= control target key end

     0   :  { %10 = vsyncpa [#allocation3], 0  ;;  %s721_s0 = inlined_call_operand.vmem [shape: f32[2,4,16], index: 0, kind: input, shape index: {}]   ;;  %s722_s1 = inlined_call_operand.vmem [shape: bf16[2,4], index: 1, kind: input, shape index: {}]   ;;  %s723_s2 = inlined_call_operand.vmem [shape: f32[2,1], index: 2, kind: input, shape index: {}]   ;;  %s724_s3 = inlined_call_operand.vmem [shape: bf16[4,6], index: 3, kind: input, shape index: {}]   ;;  %s725_s4 = inlined_call_operand.vmem [shape: f32[4,1], index: 4, kind: input, shape index: {}]   ;;  %s726_s5 = inlined_call_operand.hbm [shape: f32[2,4,16], index: 5, kind: output, shape index: {}]  }
   0x1   :  { %12 = vsyncpa [#allocation3 + $0x1], 0  ;;  %s607_s18 = smov 0   ;;  %s609_s19 = smov 0  }
   0x2   :  { %s611_s20 = smov 0   ;;  %s613_s21 = smov 0  }
   0x3 LB: > { %s628_s22 = sadd.s32 4294967295, %s568_s21   ;;  %s432_s23 = sadd.s32 4294967294, %s568_s21   ;;  %s568_s21 = sphi %s613_s21, %s732_s21   ;;  %s564_s20 = sphi %s611_s20, %s731_s20   ;;  %s560_s19 = sphi %s609_s19, %s730_s19   ;;  %s556_s18 = sphi %s607_s18, %s729_s18  }
   0x4   : > { %s632_s24 = sadd.s32 1, %s568_s21   ;;  %s135_s25 = sadd.s32 1, %s564_s20 }
   0x5   : > { %s132_s26 = ssub.s32 %s568_s21, %s632_s24  ;;  %p145_p0 = scmp.ne.s32.totalorder %s564_s20, %s560_s19 }
   0x6   : > { %p133_p1 = scmp.eq.s32.totalorder %s132_s26, 0  ;;  %p146_p2 = scmp.eq.s32.totalorder %s628_s22, 1 }
   0x7   : > { %p151_p3 = scmp.ne.s32.totalorder %s560_s19, %s556_s18  ;;  %p152_p4 = scmp.eq.s32.totalorder %s432_s23, 1 }
   0x8   : > { %s643_s27 = scalar_select %p133_p1, %s564_s20, %s135_s25  }
   0x9   : > { %p645_p5 = por %p146_p2, %p145_p0  ;;  %p649_p6 = por %p152_p4, %p151_p3 }
   0xa   : > { %p435_p7 = scmp.ge.s32.totalorder %s568_s21, 1  ;;  %p189_p8 = scmp.lt.s32.totalorder %s568_s21, 3 }
   0xc   : > { %p190_p9 = pnand %p435_p7, %p189_p8 }
   0xd   : > { %p216_p10 = scmp.lt.s32.totalorder (!%p190_p9), %s628_s22, 1  ;;  %v570_v0 = vmov (!%p190_p9), 0.0   ;;  %vm571_vm0 = vmmov (!%p190_p9), 0   ;;  %v224_v1 = vld [vmem:[%s723_s2] sm:$0x3] (!%p190_p9)  ;;  %v572_v2 = vmov (!%p190_p9), 0  }
   0xe   : > { %193 = sbr.rel (%p190_p9) target bundleno = 725 (0x2d5), region = 40  ;;  %448 = vmatprep.subr.bf16.mxu0 (!%p190_p9), %v570_v0  ;;  %450 = vmatprep.mubr.msk.bf16.mxu0 (!%p190_p9), %vm571_vm0, %v570_v0  ;;  %vm234_vm1 = vcmask (!%p190_p9), 1041408   ;;  %v223_v6 = vld [vmem:[%s722_s1] sm:$0x1] (!%p190_p9)  ;;  %vm230_vm2 = vcmask (!%p190_p9), 31744   ;;  %s573_s14 = smov (!%p190_p9), 1  }
   0xf   : > { %505 = vset.pattern.permute.xlu0 (!%p190_p9), %v572_v2  ;;  %454 = vmatprep.subr.bf16.mxu1 (!%p190_p9), %v570_v0  ;;  %v302_v15 = vld [vmem:[%s725_s4] sm:$0xf] (!%p190_p9)  ;;  %vm283_vm3 = vcmask (!%p190_p9), 7168   ;;  %vm287_vm4 = vcmask (!%p190_p9), 138240   ;;  %s574_s17 = smov (!%p190_p9), 127   ;;  %s575_s23 = smov (!%p190_p9), 126  }
  0x10   : > { %227 = vperm.xlu0 (!%p190_p9), %505, %v224_v1   ;;  %456 = vmatprep.mubr.msk.bf16.mxu1 (!%p190_p9), %vm571_vm0, %v570_v0  ;;  %vm296_vm5 = vcmask (!%p190_p9), 1040384   ;;  %vm312_vm6 = vcmask (!%p190_p9), 1042432   ;;  %v301_v26 = vld [vmem:[%s724_s3] sm:$0x3] (!%p190_p9)  ;;  %vm308_vm7 = vcmask (!%p190_p9), 48128   ;;  %s213_s30 = sand.u32 (!%p190_p9), 1, %s560_s19  }
  0x11   : > { %s436_s6 = sshll.u32 (!%p190_p9), %s213_s30, 2  ;;  %vm357_vm8 = vcmask (!%p190_p9), 125952   ;;  %s360_s13 = scalar_lea.sflag (!%p190_p9), [#allocation3], %s213_s30 }
  0x15   : > { %s217_s7 = scalar_select %p216_p10, %s628_s22, 1 }
  0x17   : > { %s437_s8 = sshll.u32 %s217_s7, 2  ;;  %s441_s7 = sshll.u32 %s628_s22, 6 }
  0x18   : > { %s219_s11 = scalar_lea.vmem %s721_s0, %s437_s8  ;;  %s215_s8 = scalar_lea.vmem [#allocation2], %s436_s6 }
  0x19   : > { %v221_v3 = vld [vmem:[%s219_s11] sm:$0xf]  ;;  %s373_s9 = sshll.u32 %s215_s8, 4  ;;  %s679_s12 = scalar_lea.hbm %s726_s5, %s441_s7  ;;  %s681_s9 = int_to_ptr.vmem [resolvable:$true] %s373_s9 }
  0x1a   : > { %v222_v4 = vpack.c.bf16 %v221_v3, %v221_v3  ;;  %s576_s22 = smov [#allocation2]  }
  0x1b   : > { %s510_s15 = sshll.u32 %s576_s22, 4  ;;  %s511_s15 = int_to_ptr.vmem [resolvable:$false] %s510_s15 }
  0x1c   : > { %v236_v5 = vsel %vm234_vm1, %v222_v4, 0  ;;  %s512_s16 = scalar_lea.vmem %s511_s15, 128  ;;  %p513_p0 = scmp.lt.s32.totalorder %s681_s9, %s511_s15 }
  0x1d   : > { %449 = vmatpush3.bf16.msra.mxu0 %v236_v5 }
  0x20   : > { %451 = vmatmul.mubr.msk.bf16.vlgmr.msra.gmra.mrb[0].mxu0 %vm230_vm2, %v223_v6 }
  0x8f   : > { %v228_v7 = vpop.permute.xlu0 %227 }
  0xf3   : > { %v272_v8 = vpop.f32.mrb[0].mxu0 }
  0xf4   : > { %v273_v9 = vadd.f32 %v272_v8, %v228_v7  ;;  %v452_v10 = vpop.f32.mrb[1].mxu0 }
  0xf5   : > { %v275_v11 = vpop.f32.mrb[2].mxu0 }
  0xf6   : > { %v278_v12 = vmax.f32 %v273_v9, 0.0  ;;  %v453_v13 = vpop.f32.mrb[3].mxu0 }
  0xf8   : > { %v279_v14 = vpack.c.bf16 %v278_v12, %v278_v12 }
  0xfa   : > { %281 = vrot.lane.b32.xlu0 %v279_v14, %s573_s14  ;;  %s506_s14 = scalar_lea.vmem %s681_s9, 64 }
  0xfb   : > { %p507_p11 = scmp.ne.s32.totalorder %s681_s9, %s506_s14  ;;  %p514_p1 = scmp.lt.s32.totalorder %s512_s16, %s506_s14 }
  0xfd   : > { %p508_p12 = pnand %p507_p11, %p645_p5  ;;  %p515_p2 = por %p514_p1, %p513_p0 }
  0xfe   : > { %305 = vperm.xlu0 %505, %v302_v15  }
  0xff   : > { %p509_p13 = pneg %p508_p12 }
 0x101   : > { %p516_p3 = pnand %p515_p2, %p509_p13 }
 0x16c   : > { %v282_v16 = vpop.permute.xlu0 %281 }
 0x16d   : > { %v286_v17 = vsel %vm283_vm3, 0, %v282_v16 }
 0x16e   : > { %v288_v18 = vsel %vm287_vm4, %v286_v17, 0 }
 0x16f   : > { %v290_v19 = vrot.slane %v288_v18, 7  ;;  %v293_v20 = vrot.slane %v288_v18, 6 }
 0x171   : > { %291 = vrot.lane.b32.xlu1 %v290_v19, %s574_s17 }
 0x175   : > { %294 = vrot.lane.b32.xlu1 %v293_v20, %s575_s23 }
 0x17d   : > { %v306_v27 = vpop.permute.xlu0 %305 }
 0x1e3   : > { %v292_v21 = vpop.permute.xlu1 %291 }
 0x1e4   : > { %v298_v22 = vsel %vm296_vm5, %v288_v18, %v292_v21 }
 0x1e7   : > { %v295_v23 = vpop.permute.xlu1 %294 }
 0x1e8   : > { %v300_v24 = vsel %vm234_vm1, %v298_v22, %v295_v23 }
 0x1e9   : > { %v313_v25 = vsel %vm312_vm6, %v300_v24, 0 }
 0x1ea   : > { %455 = vmatpush3.bf16.msra.mxu1 %v313_v25 }
 0x1ed   : > { %457 = vmatmul.mubr.msk.bf16.vlgmr.msra.gmra.mrb[0].mxu1 %vm308_vm7, %v301_v26 }
 0x2c0   : > { %v349_v28 = vpop.f32.mrb[0].mxu1 }
 0x2c1   : > { %v350_v29 = vadd.f32 %v349_v28, %v306_v27  ;;  %v458_v30 = vpop.f32.mrb[1].mxu1 }
 0x2c2   : > { %v352_v31 = vpop.f32.mrb[2].mxu1 }
 0x2c3   : > { %v355_v32 = vmax.f32 %v350_v29, 0.0  ;;  %v459_v33 = vpop.f32.mrb[3].mxu1 }
 0x2c5   : > { %v356_v34 = vadd.f32 %v355_v32, %v221_v3 }
 0x2c7   : > { %358 = vst.msk [vmem:[%s215_s8] sm:$0xf] %vm357_vm8, %v356_v34 }
 0x2c8   : > { %519 = shalt.err (!%p516_p3)
}
 0x2c9   : > { %s520_s17 = scalar_lea.hbm %s679_s12, 64  ;;  %s524_s26 = scalar_lea.hbm %s726_s5, 128 }
 0x2ca   : > { %p521_p4 = scmp.ne.s32.totalorder %s679_s12, %s520_s17  ;;  %p525_p9 = scmp.lt.u32.totalorder %s679_s12, %s726_s5 }
 0x2cb   : > { %p526_p10 = scmp.lt.u32.totalorder %s524_s26, %s520_s17  ;;  %p528_p12 = scmp.lt.u32.totalorder %s520_s17, %s679_s12 }
 0x2cc   : > { %p522_p7 = pnand %p521_p4, %p645_p5 }
 0x2cd   : > { %p527_p11 = por %p526_p10, %p525_p9 }
 0x2ce   : > { %p523_p8 = pneg %p522_p7 }
 0x2cf   : > { %p529_p13 = por %p528_p12, %p527_p11 }
 0x2d1   : > { %p530_p0 = pnand %p529_p13, %p523_p8 }
 0x2d3   : > { %533 = shalt.err (!%p530_p0)
}
 0x2d4   : > { %460 = dma.vmem_to_hbm [thread:$0]  (%p645_p5), %s681_s9, 64, %s679_s12, %s360_s13  }
 0x2d5 PF: > { %p466_p1 = scmp.ge.s32.totalorder %s568_s21, 2  ;;  %s385_s7 = sand.u32 1, %s556_s18  }
 0x2d6   : > { %s386_s8 = scalar_lea.sflag [#allocation3], %s385_s7 }
 0x2d7   : > { %p463_p2 = pnand %p466_p1, %p649_p6 }
 0x2d9   : > { %551 = dma.done.wait (!%p463_p2), %s386_s8, 64  }
 0x2da   : > { %553 = vsyncadd (!%p463_p2), %s386_s8, 4294967232  ;;  %p15_p3 = scmp.ge.s32.totalorder %s632_s24, 4   ;;  %s729_s18 = smov %s560_s19 }
 0x2db   : > { %s730_s19 = smov %s564_s20  ;;  %s731_s20 = smov %s643_s27 }
 0x2dc   : > { %s732_s21 = smov %s632_s24  ;;  %17 = sbr.rel (!%p15_p3) target bundleno = 3 (0x3), region = 75 }
 0x2e3   :  { %391 = vsyncpa [#allocation3], 1 }
 0x2e4   :  { %393 = vsyncpa [#allocation3 + $0x1], 1 }

</bundles_post_ra>
